<compile_context>
chip_gen: v5e
topology: v5e:2x2
jax: 0.10.0
libtpu: 0.0.40
codegen_flags: <defaults>
</compile_context>

<pallas_src>
import jax
import jax.numpy as jnp
from jax.experimental import pallas as pl
from jax.experimental.pallas import tpu as pltpu


def channel_attention_kernel(x_ref, w1t_ref, w2t_ref, o_ref):
    # x_ref : (Bt, C, HW)  Bt batch elements, spatial flattened into lanes
    # w1t_ref: (C, Cr)     transpose of first 1x1 conv weight (squeeze)
    # w2t_ref: (Cr, C)     transpose of second 1x1 conv weight (excite)
    # o_ref : (Bt, C, HW)
    bt, c, hw = x_ref.shape
    inv_hw = 1.0 / hw

    # --- pooling (accumulate in fp32), re-reading the ref per use ----------
    avg = jnp.sum(x_ref[...], axis=-1, dtype=jnp.float32) * inv_hw   # (Bt, C)
    mx = jnp.max(x_ref[...], axis=-1).astype(jnp.float32)            # (Bt, C)

    # --- shared MLP, both pooled vectors in ONE pair of tiny matmuls -------
    pooled = jnp.concatenate([avg, mx], axis=0)                      # (2*Bt, C)
    w1t = w1t_ref[...].astype(jnp.float32)                           # (C, Cr)
    w2t = w2t_ref[...].astype(jnp.float32)                           # (Cr, C)
    h = jnp.dot(pooled, w1t, preferred_element_type=jnp.float32)     # (2*Bt, Cr)
    h = jnp.maximum(h, 0.0)                                          # ReLU
    mlp = jnp.dot(h, w2t, preferred_element_type=jnp.float32)        # (2*Bt, C)

    gate = jax.nn.sigmoid(mlp[:bt] + mlp[bt:])                       # (Bt, C)

    # --- scale in native dtype (no fp32 copy of the big tile) --------------
    o_ref[...] = x_ref[...] * gate.astype(o_ref.dtype)[:, :, None]


def _vmem_capacity_bytes():
    """Physical VMEM of the current chip; conservative fallback = 64 MiB."""
    try:
        info = pltpu.get_tpu_info()
        cap = getattr(info, "vmem_capacity_bytes", None)
        if cap:
            return int(cap)
    except Exception:
        pass
    return 64 * 1024 * 1024


def _pick_block_batch(B, bytes_per_batch, budget_bytes, min_steps=1):
    """Largest Bt dividing B that fits the VMEM budget and (when B allows and
    min_steps > 1, i.e. multi-TensorCore chips) leaves >= min_steps steps."""
    best = 1
    for bt in range(1, B + 1):
        if B % bt:
            continue
        if bt * bytes_per_batch > budget_bytes:
            continue
        if min_steps > 1 and B >= min_steps and (B // bt) < min_steps:
            continue
        best = bt
    return best


def channel_attention(x, w1, w2):
    """x: (B, C, H, W) NCHW; w1: (Cr, C); w2: (C, Cr). Returns (B, C, H, W)."""
    B, C, H, W = x.shape
    Cr = w1.shape[0]
    HW = H * W
    itemsize = x.dtype.itemsize

    x_flat = x.reshape(B, C, HW)   # contiguous per-batch (C, HW) blocks in HBM

    # --- generation-aware tile sizing --------------------------------------
    vmem_cap = _vmem_capacity_bytes()
    multi_core = vmem_cap <= 64 * 1024 * 1024   # v7x: 64 MiB/TC, 2 TCs/chip
    if multi_core:
        budget = 36 * 1024 * 1024
        vmem_limit = 48 * 1024 * 1024
        min_steps = 4 if B >= 4 else (2 if B >= 2 else 1)
    else:
        # v5e / v6e: single TensorCore, 128 MiB physical VMEM -> big tiles,
        # one (or few) big steps beats many small ones for this mem-bound op.
        budget = 64 * 1024 * 1024
        vmem_limit = 96 * 1024 * 1024
        min_steps = 1

    # 2 input + 2 output double buffers + ~1 tile-sized temporary per block.
    bytes_per_batch = C * HW * itemsize * 5
    if bytes_per_batch > budget:
        # TODO(synk): two-phase HW-tiled path (reduce pass over lane chunks +
        # scale pass) for spatial maps too large for one (1, C, HW) block
        # (v7x-critical, e.g. C=64 @ 224x224).  For now widen the limit.
        vmem_limit = min(int(vmem_cap * 0.9),
                         max(vmem_limit, bytes_per_batch + (8 << 20)))
    bt = _pick_block_batch(B, bytes_per_batch, budget, min_steps)
    grid_steps = B // bt

    # pre-transpose the tiny weights so the kernel does plain row-major matmuls
    w1t = jnp.transpose(w1)   # (C, Cr)
    w2t = jnp.transpose(w2)   # (Cr, C)

    # Deeper input buffering only for the many-small-steps regime (small
    # tiles, far from the VMEM budget); default double-buffer otherwise.
    x_index_map = lambda b: (b, 0, 0)
    if grid_steps >= 8 and bt * C * HW * itemsize * 6 <= budget:
        x_spec = pl.BlockSpec((bt, C, HW), x_index_map,
                              pipeline_mode=pl.Buffered(3))
    else:
        x_spec = pl.BlockSpec((bt, C, HW), x_index_map)

    cost = pl.CostEstimate(
        flops=8 * B * C * Cr,                      # two tiny MLP matmuls
        transcendentals=B * C,                     # sigmoid
        bytes_accessed=2 * B * C * HW * itemsize,  # read + write of the tensor
    )

    out_flat = pl.pallas_call(
        channel_attention_kernel,
        out_shape=jax.ShapeDtypeStruct((B, C, HW), x.dtype),
        grid_spec=pltpu.PrefetchScalarGridSpec(
            num_scalar_prefetch=0,
            grid=(grid_steps,),
            in_specs=[
                x_spec,
                pl.BlockSpec((C, Cr), lambda b: (0, 0)),
                pl.BlockSpec((Cr, C), lambda b: (0, 0)),
            ],
            out_specs=pl.BlockSpec((bt, C, HW), lambda b: (b, 0, 0)),
        ),
        compiler_params=pltpu.CompilerParams(
            dimension_semantics=("parallel",),
            vmem_limit_bytes=vmem_limit,
        ),
        cost_estimate=cost,
    )(x_flat, w1t, w2t)

    return out_flat.reshape(B, C, H, W)


def channel_attention_ref(x, w1, w2):
    """Pure-JAX reference mirroring the PyTorch ChannelAttention.forward."""
    avg = jnp.mean(x, axis=(2, 3), keepdims=True)  # (B, C, 1, 1)
    mx = jnp.max(x, axis=(2, 3), keepdims=True)    # (B, C, 1, 1)

    def fc(v):  # v: (B, C, 1, 1)
        v = v[..., 0, 0]                            # (B, C)
        h = jnp.maximum(v @ w1.T, 0.0)              # (B, Cr)
        o = h @ w2.T                                # (B, C)
        return o[..., None, None]

    gate = jax.nn.sigmoid(fc(avg) + fc(mx))
    return gate * x


if __name__ == "__main__":
    # Matches ca1 of AttentionCNN: ChannelAttention(32, reduction=16) -> Cr=2
    B, C, H, W = 2, 32, 16, 16
    reduction = 16
    Cr = C // reduction

    key = jax.random.PRNGKey(0)
    kx, k1, k2, kx2 = jax.random.split(key, 4)

    x = jax.random.normal(kx, (B, C, H, W), dtype=jnp.float32)
    # Conv2d weights (out, in, 1, 1) squeezed to (out, in), bias-free.
    w1 = jax.random.normal(k1, (Cr, C), dtype=jnp.float32) * (1.0 / jnp.sqrt(C))
    w2 = jax.random.normal(k2, (C, Cr), dtype=jnp.float32) * (1.0 / jnp.sqrt(Cr))

    out = channel_attention(x, w1, w2)
    out = jax.block_until_ready(out)
    ref = channel_attention_ref(x, w1, w2)
    assert out.shape == (B, C, H, W)
    assert jnp.allclose(out, ref, atol=1e-5, rtol=1e-5), "mismatch vs reference"

    # Second check: non-128-multiple spatial size (14x14 = 196 lanes) now runs
    # UNPADDED — the block carries the true HW extent (last two block dims
    # equal the full array dims), exercising the tail masked-store path.
    H2 = W2 = 14
    x2 = jax.random.normal(kx2, (B, C, H2, W2), dtype=jnp.float32)
    out2 = jax.block_until_ready(channel_attention(x2, w1, w2))
    ref2 = channel_attention_ref(x2, w1, w2)
    assert out2.shape == (B, C, H2, W2)
    assert jnp.allclose(out2, ref2, atol=1e-5, rtol=1e-5), "mismatch (unpadded HW)"

    print("KERNEL_OK")
</pallas_src>

<mosaic_0001>
module attributes {stable_mosaic.version = 11 : i64} {
  func.func @channel_attention_kernel(%arg0: i32, %arg1: memref<1x32x256xf32, #tpu.memory_space<vmem>>, %arg2: memref<32x2xf32, #tpu.memory_space<vmem>>, %arg3: memref<2x32xf32, #tpu.memory_space<vmem>>, %arg4: memref<1x32x256xf32, #tpu.memory_space<vmem>>) attributes {dimension_semantics = [#tpu.dimension_semantics<parallel>], iteration_bounds = array<i64: 2>, scalar_prefetch = 0 : i64, scratch_operands = 0 : i64, tpu.core_type = #tpu.core_type<tc>, window_params = [{transform_indices = @transform_0, window_bounds = array<i64: 1, 32, 256>}, {pipeline_mode = #tpu.pipeline_mode<synchronous>, transform_indices = @transform_1, window_bounds = array<i64: 32, 2>}, {pipeline_mode = #tpu.pipeline_mode<synchronous>, transform_indices = @transform_2, window_bounds = array<i64: 2, 32>}, {transform_indices = @transform_3, window_bounds = array<i64: 1, 32, 256>}]} {
    %c0 = arith.constant 0 : index
    %c0_0 = arith.constant 0 : index
    %c0_1 = arith.constant 0 : index
    %0 = vector.load %arg1[%c0, %c0_0, %c0_1] : memref<1x32x256xf32, #tpu.memory_space<vmem>>, vector<1x32x256xf32>
    %cst = arith.constant dense<0.000000e+00> : vector<1x32xf32>
    %1 = vector.multi_reduction <add>, %0, %cst [2] : vector<1x32x256xf32> to vector<1x32xf32>
    %cst_2 = arith.constant 3.906250e-03 : f32
    %2 = vector.broadcast %cst_2 : f32 to vector<1x32xf32>
    %3 = arith.mulf %1, %2 : vector<1x32xf32>
    %c0_3 = arith.constant 0 : index
    %c0_4 = arith.constant 0 : index
    %c0_5 = arith.constant 0 : index
    %4 = vector.load %arg1[%c0_3, %c0_4, %c0_5] : memref<1x32x256xf32, #tpu.memory_space<vmem>>, vector<1x32x256xf32>
    %cst_6 = arith.constant dense<0xFF800000> : vector<1x32xf32>
    %5 = vector.multi_reduction <maximumf>, %4, %cst_6 [2] : vector<1x32x256xf32> to vector<1x32xf32>
    %6 = tpu.concatenate %3, %5 in 0 : vector<1x32xf32>, vector<1x32xf32> -> vector<2x32xf32>
    %c0_7 = arith.constant 0 : index
    %c0_8 = arith.constant 0 : index
    %7 = vector.load %arg2[%c0_7, %c0_8] : memref<32x2xf32, #tpu.memory_space<vmem>>, vector<32x2xf32>
    %c0_9 = arith.constant 0 : index
    %c0_10 = arith.constant 0 : index
    %8 = vector.load %arg3[%c0_9, %c0_10] : memref<2x32xf32, #tpu.memory_space<vmem>>, vector<2x32xf32>
    %cst_11 = arith.constant dense<0.000000e+00> : vector<2x2xf32>
    %9 = tpu.matmul %6, %7, %cst_11 {dimension_numbers = #tpu.dot_dimension_numbers<[1], [0], [0], [1], [0, 0, 1, 1], [], []>} : vector<2x32xf32>, vector<32x2xf32>, vector<2x2xf32> -> vector<2x2xf32>
    %cst_12 = arith.constant 0.000000e+00 : f32
    %10 = vector.broadcast %cst_12 : f32 to vector<2x2xf32>
    %11 = arith.maximumf %9, %10 : vector<2x2xf32>
    %cst_13 = arith.constant dense<0.000000e+00> : vector<2x32xf32>
    %12 = tpu.matmul %11, %8, %cst_13 {dimension_numbers = #tpu.dot_dimension_numbers<[1], [0], [0], [1], [0, 0, 1, 1], [], []>} : vector<2x2xf32>, vector<2x32xf32>, vector<2x32xf32> -> vector<2x32xf32>
    %13 = vector.extract_strided_slice %12 {offsets = [0, 0], sizes = [1, 32], strides = [1, 1]} : vector<2x32xf32> to vector<1x32xf32>
    %14 = vector.extract_strided_slice %12 {offsets = [1, 0], sizes = [1, 32], strides = [1, 1]} : vector<2x32xf32> to vector<1x32xf32>
    %15 = arith.addf %13, %14 : vector<1x32xf32>
    %16 = arith.negf %15 : vector<1x32xf32>
    %17 = math.exp %16 : vector<1x32xf32>
    %cst_14 = arith.constant 1.000000e+00 : f32
    %18 = vector.broadcast %cst_14 : f32 to vector<1x32xf32>
    %19 = arith.addf %18, %17 : vector<1x32xf32>
    %20 = arith.divf %18, %19 : vector<1x32xf32>
    %c0_15 = arith.constant 0 : index
    %c0_16 = arith.constant 0 : index
    %c0_17 = arith.constant 0 : index
    %21 = vector.load %arg1[%c0_15, %c0_16, %c0_17] : memref<1x32x256xf32, #tpu.memory_space<vmem>>, vector<1x32x256xf32>
    %22 = vector.shape_cast %20 : vector<1x32xf32> to vector<1x32x1xf32>
    %23 = vector.broadcast %22 : vector<1x32x1xf32> to vector<1x32x256xf32>
    %24 = arith.mulf %21, %23 : vector<1x32x256xf32>
    %c0_18 = arith.constant 0 : index
    %c0_19 = arith.constant 0 : index
    %c0_20 = arith.constant 0 : index
    %25 = vector.load %arg4[%c0_18, %c0_19, %c0_20] : memref<1x32x256xf32, #tpu.memory_space<vmem>>, vector<1x32x256xf32>
    tpu.vector_store %arg4[%c0_18, %c0_19, %c0_20], %24 {strides = array<i32>} : memref<1x32x256xf32, #tpu.memory_space<vmem>>, vector<1x32x256xf32>,
    return
  }
  func.func @transform_0(%arg0: i32) -> (i32, i32, i32) {
    %c0_i32 = arith.constant 0 : i32
    %c0_i32_0 = arith.constant 0 : i32
    %c0_i32_1 = arith.constant 0 : i32
    return %arg0, %c0_i32, %c0_i32_0 : i32, i32, i32
  }
  func.func @transform_1(%arg0: i32) -> (i32, i32) {
    %c0_i32 = arith.constant 0 : i32
    %c0_i32_0 = arith.constant 0 : i32
    %c0_i32_1 = arith.constant 0 : i32
    return %c0_i32, %c0_i32_0 : i32, i32
  }
  func.func @transform_2(%arg0: i32) -> (i32, i32) {
    %c0_i32 = arith.constant 0 : i32
    %c0_i32_0 = arith.constant 0 : i32
    %c0_i32_1 = arith.constant 0 : i32
    return %c0_i32, %c0_i32_0 : i32, i32
  }
  func.func @transform_3(%arg0: i32) -> (i32, i32, i32) {
    %c0_i32 = arith.constant 0 : i32
    %c0_i32_0 = arith.constant 0 : i32
    %c0_i32_1 = arith.constant 0 : i32
    return %arg0, %c0_i32, %c0_i32_0 : i32, i32, i32
  }
}

</mosaic_0001>

<bundles_post_ra>
// kernel: tpu_custom_call.1
= control target key start
LH: loop header
LB: loop body
LE: loop exit
PB: predicated region body
PF: predicated region fallthrough
CT: control target
= control target key end

     0   :  { %8 = vsyncpa [#allocation3], 0  ;;  %s859_s0 = inlined_call_operand.hbm [shape: f32[2,32,256], index: 0, kind: input, shape index: {}]   ;;  %s860_s1 = inlined_call_operand.vmem [shape: f32[32,2], index: 1, kind: input, shape index: {}]   ;;  %s861_s2 = inlined_call_operand.vmem [shape: f32[2,32], index: 2, kind: input, shape index: {}]   ;;  %s862_s3 = inlined_call_operand.hbm [shape: f32[2,32,256], index: 3, kind: output, shape index: {}]  }
   0x1   :  { %10 = vsyncpa [#allocation3 + $0x1], 0 }
   0x2   :  { %11 = vsyncpa [#allocation4], 0 }
   0x3   :  { %13 = vsyncpa [#allocation4 + $0x1], 0  ;;  %s673_s12 = smov 0   ;;  %s675_s13 = smov 0  }
   0x4   :  { %s677_s14 = smov 0   ;;  %s679_s15 = smov 0  }
   0x5 LB: > { %s694_s16 = sadd.s32 4294967295, %s647_s15   ;;  %s472_s17 = sadd.s32 4294967294, %s647_s15   ;;  %s647_s15 = sphi %s679_s15, %s872_s15   ;;  %s643_s14 = sphi %s677_s14, %s871_s14   ;;  %s639_s13 = sphi %s675_s13, %s870_s13   ;;  %s635_s12 = sphi %s673_s12, %s869_s12  }
   0x6   : > { %s698_s18 = sadd.s32 1, %s647_s15   ;;  %s26_s19 = sadd.s32 1, %s643_s14 }
   0x7   : > { %s23_s20 = ssub.s32 %s647_s15, %s698_s18  ;;  %p33_p0 = scmp.ne.s32.totalorder %s643_s14, %s639_s13 }
   0x8   : > { %p24_p1 = scmp.eq.s32.totalorder %s23_s20, 0  ;;  %p34_p2 = scmp.eq.s32.totalorder %s647_s15, 0 }
   0x9   : > { %p39_p3 = scmp.ne.s32.totalorder %s639_s13, %s635_s12  ;;  %p40_p4 = scmp.eq.s32.totalorder %s694_s16, 0 }
   0xa   : > { %s710_s21 = scalar_select %p24_p1, %s643_s14, %s26_s19  }
   0xb   : > { %p712_p5 = por %p34_p2, %p33_p0  ;;  %p716_p6 = por %p40_p4, %p39_p3 }
   0xc   : > { %p105_p7 = scmp.eq.s32.totalorder %s694_s16, 1  ;;  %p111_p8 = scmp.eq.s32.totalorder %s472_s17, 1 }
   0xd   : > { %p504_p10 = scmp.lt.s32.totalorder %s647_s15, 2  ;;  %s137_s26 = sand.u32 1, %s643_s14  }
   0xe   : > { %p723_p11 = por %p105_p7, %p33_p0  ;;  %p727_p12 = por %p111_p8, %p39_p3 }
   0xf   : > { %s490_s27 = sshll.u32 %s647_s15, 6  ;;  %s475_s28 = sshll.u32 %s137_s26, 6 }
  0x10   : > { %s146_s4 = scalar_lea.hbm %s859_s0, %s490_s27  ;;  %s141_s6 = scalar_lea.vmem [#allocation2], %s475_s28 }
  0x11   : > { %s147_s5 = sshll.u32 %s146_s4, 4  ;;  %s149_s7 = sshll.u32 %s141_s6, 4  ;;  %s148_s5 = int_to_ptr.hbm [resolvable:$true] %s147_s5  ;;  %s150_s7 = int_to_ptr.vmem [resolvable:$true] %s149_s7 }
  0x12   : > { %p738_p13 = pnand %p504_p10, %p712_p5  ;;  %p478_p0 = scmp.ge.s32.totalorder %s647_s15, 1 }
  0x13   : > { %p157_p1 = scmp.lt.s32.totalorder %s647_s15, 3  ;;  %s138_s9 = scalar_lea.sflag [#allocation3], %s137_s26 }
  0x14   : > { %s551_s10 = sshra.s32 %s148_s5, 4  ;;  %p555_p3 = pneg %p738_p13  ;;  %s552_s10 = int_to_ptr.hbm [resolvable:$true] %s551_s10 }
  0x15   : > { %s553_s11 = scalar_lea.hbm %s552_s10, 64  ;;  %s558_s20 = scalar_lea.hbm %s859_s0, 128 }
  0x16   : > { %p554_p2 = scmp.ne.s32.totalorder %s552_s10, %s553_s11  ;;  %p559_p5 = scmp.lt.s32.totalorder %s552_s10, %s859_s0 }
  0x17   : > { %p560_p8 = scmp.lt.s32.totalorder %s558_s20, %s553_s11 }
  0x18   : > { %p556_p4 = pnand %p555_p3, %p554_p2 }
  0x19   : > { %p561_p10 = por %p560_p8, %p559_p5 }
  0x1a   : > { %p557_p7 = pneg %p556_p4 }
  0x1c   : > { %p562_p9 = pnand %p561_p10, %p557_p7 }
  0x1e   : > { %565 = shalt.err (!%p562_p9)
}
  0x1f   : > { %s649_s26 = smov 256   ;;  %s650_s28 = smov 16  }
  0x20   : > { %499 = dma.hbm_to_vmem [thread:$0]  (!%p738_p13), %s148_s5, 1024, %s150_s7, %s138_s9, %s649_s26, %s649_s26, %s650_s28  }
  0x21   : > { %p158_p2 = pnand %p478_p0, %p157_p1 }
  0x22   : > { %s759_s29 = sand.u32 (!%p158_p2), 1, %s639_s13  }
  0x23   : > { %161 = sbr.rel (%p158_p2) target bundleno = 593 (0x251), region = 32  ;;  %s479_s30 = sshll.u32 (!%p158_p2), %s759_s29, 6 }
  0x24   : > { %s164_s4 = scalar_lea.sflag (!%p158_p2), [#allocation3], %s759_s29  ;;  %s167_s6 = scalar_lea.vmem (!%p158_p2), [#allocation2], %s479_s30 }
  0x28   : > { %626 = dma.done.wait (%p716_p6), %s164_s4, 1024  }
  0x29   : > { %628 = vsyncadd (%p716_p6), %s164_s4, 4294966272  ;;  %v769_v0 = vld [vmem:[%s167_s6] sm:$0xff]  ;;  %v771_v1 = vld [vmem:[%s167_s6 + $0x8] sm:$0xff]  ;;  %v231_v23 = vlaneseq  ;;  %vm236_vm0 = vcmask 130112   ;;  %vm240_vm1 = vcmask 195712   ;;  %vm244_vm2 = vcmask 261312  }
  0x2a   : > { %v773_v2 = vld [vmem:[%s167_s6 + $0x20] sm:$0xff]  ;;  %v215_v3 = vmax.f32 %v769_v0, %v771_v1  ;;  %v199_v4 = vadd.f32 %v771_v1, %v769_v0  ;;  %v779_v5 = vld [vmem:[%s167_s6 + $0x28] sm:$0xff]  ;;  %v783_v7 = vld [vmem:[%s167_s6 + $0x10] sm:$0xff]  ;;  %vm259_vm3 = vcmask 1040384   ;;  %vm266_vm4 = vcmask 261120   ;;  %s190_s22 = scalar_lea.vmem [#allocation5], %s479_s30 }
  0x2b   : > { %v205_v6 = vadd.f32 %v779_v5, %v773_v2  ;;  %v785_v8 = vld [vmem:[%s167_s6 + $0x18] sm:$0xff]  ;;  %v787_v9 = vld [vmem:[%s167_s6 + $0x30] sm:$0xff]  ;;  %v221_v14 = vmax.f32 %v773_v2, %v779_v5  ;;  %v262_v18 = vld [vmem:[%s860_s1 + $0x8] sm:$0xff]  ;;  %v232_v24 = vand.u32 127, %v231_v23  ;;  %vm295_vm5 = vcmask 1041408   ;;  %s491_s27 = sshll.u32 %s694_s16, 6 }
  0x2c   : > { %216 = vmax.xlane.f32.xlu2 %v215_v3  ;;  %200 = vadd.xlane.f32.xlu0 %v199_v4  ;;  %v789_v10 = vld [vmem:[%s167_s6 + $0x38] sm:$0xff]  ;;  %v218_v11 = vmax.f32 %v783_v7, %v785_v8  ;;  %v202_v12 = vadd.f32 %v785_v8, %v783_v7  ;;  %v263_v17 = vld [vmem:[%s860_s1 + $0x10] sm:$0xff]  ;;  %v261_v19 = vld [vmem:[%s860_s1] sm:$0xff]  ;;  %vm291_vm6 = vcmask 15360   ;;  %v344_v55 = vshrl.u32 %v231_v23, 7  ;;  %s395_s4 = scalar_lea.hbm %s862_s3, %s491_s27  ;;  %s396_s6 = sshll.u32 %s190_s22, 4  ;;  %s397_s6 = int_to_ptr.vmem [resolvable:$true] %s396_s6 }
  0x2d   : > { %206 = vadd.xlane.f32.xlu1 %v205_v6  ;;  %v208_v13 = vadd.f32 %v789_v10, %v787_v9  ;;  %v224_v15 = vmax.f32 %v787_v9, %v789_v10  ;;  %v264_v16 = vld [vmem:[%s860_s1 + $0x18] sm:$0xff]  ;;  %v234_v27 = vadd.s32 4294967288, %v232_v24  ;;  %v238_v30 = vadd.s32 4294967280, %v232_v24  ;;  %v265_v52 = vld [vmem:[%s861_s2] sm:$0x3]  ;;  %s398_s23 = sshll.u32 %s395_s4, 4  ;;  %s399_s23 = int_to_ptr.hbm [resolvable:$true] %s398_s23 }
  0x2e   : > { %282 = vmatpush.msra.mxu0 %v264_v16  ;;  %v242_v35 = vadd.s32 4294967272, %v232_v24  ;;  %482 = vmatpush.msk.msra.mxu1 %vm295_vm5, %v265_v52  ;;  %v357_v56 = vadd.s32 16, %v344_v55  ;;  %v351_v57 = vadd.s32 8, %v344_v55  ;;  %s384_s16 = scalar_lea.sflag [#allocation4], %s759_s29  ;;  %s595_s30 = sshra.s32 %s399_s23, 4  ;;  %s596_s30 = int_to_ptr.hbm [resolvable:$true] %s595_s30 }
  0x2f   : > { %542 = vset.pattern.permute.xlu2 %v344_v55  ;;  %s597_s5 = scalar_lea.hbm %s596_s30, 64  ;;  %s601_s9 = scalar_lea.hbm %s862_s3, 128 }
  0x30   : > { %283 = vmatpush.msra.mxu0 %v263_v17  ;;  %544 = vset.pattern.permute.xlu1 %v357_v56  ;;  %p598_p6 = scmp.ne.s32.totalorder %s596_s30, %s597_s5  ;;  %p602_p0 = scmp.lt.s32.totalorder %s596_s30, %s862_s3 }
  0x31   : > { %543 = vset.pattern.permute.xlu0 %v351_v57  ;;  %p603_p1 = scmp.lt.s32.totalorder %s601_s9, %s597_s5 }
  0x32   : > { %284 = vmatpush.msra.mxu0 %v262_v18  ;;  %p599_p9 = pnand %p598_p6, %p723_p11 }
  0x33   : > { %p604_p3 = por %p603_p1, %p602_p0 }
  0x34   : > { %219 = vmax.xlane.f32.xlu2 %v218_v11  ;;  %203 = vadd.xlane.f32.xlu0 %v202_v12  ;;  %p600_p13 = pneg %p599_p9 }
  0x35   : > { %209 = vadd.xlane.f32.xlu1 %v208_v13  ;;  %285 = vmatpush.msra.mxu0 %v261_v19  ;;  %v363_v19 = vadd.s32 24, %v344_v55 }
  0x36   : > { %p605_p4 = pnand %p604_p3, %p600_p13 }
  0x3c   : > { %222 = vmax.xlane.f32.xlu0 %v221_v14 }
  0x3d   : > { %225 = vmax.xlane.f32.xlu1 %v224_v15 }
  0x9f   : > { %v201_v20 = vpop.xlane.xlu0 %200  ;;  %v217_v21 = vpop.xlane.xlu2 %216 }
  0xa0   : > { %v207_v22 = vpop.xlane.xlu1 %206  ;;  %v211_v25 = vmul.f32 0.00390625, %v201_v20  ;;  %v251_v37 = vperm.slane %v217_v21, %v232_v24 }
  0xa1   : > { %v213_v31 = vmul.f32 0.00390625, %v207_v22 }
  0xa2   : > { %v233_v34 = vperm.slane %v211_v25, %v232_v24 }
  0xa3   : > { %v239_v40 = vperm.slane %v213_v31, %v238_v30 }
  0xa7   : > { %v204_v26 = vpop.xlane.xlu0 %203  ;;  %v220_v32 = vpop.xlane.xlu2 %219 }
  0xa8   : > { %v212_v28 = vmul.f32 0.00390625, %v204_v26  ;;  %v210_v29 = vpop.xlane.xlu1 %209  ;;  %v252_v38 = vperm.slane %v220_v32, %v234_v27 }
  0xa9   : > { %v214_v36 = vmul.f32 0.00390625, %v210_v29 }
  0xaa   : > { %v235_v33 = vperm.slane %v212_v28, %v234_v27  ;;  %v253_v46 = vsel %vm236_vm0, %v252_v38, %v251_v37 }
  0xab   : > { %v243_v41 = vperm.slane %v214_v36, %v242_v35 }
  0xac   : > { %v237_v39 = vsel %vm236_vm0, %v235_v33, %v233_v34 }
  0xad   : > { %v241_v45 = vsel %vm240_vm1, %v239_v40, %v237_v39 }
  0xae   : > { %v245_v49 = vsel %vm244_vm2, %v243_v41, %v241_v45 }
  0xaf   : > { %v223_v42 = vpop.xlane.xlu0 %222 }
  0xb0   : > { %v254_v43 = vperm.slane %v223_v42, %v238_v30  ;;  %v226_v44 = vpop.xlane.xlu1 %225 }
  0xb1   : > { %v256_v47 = vperm.slane %v226_v44, %v242_v35 }
  0xb2   : > { %v255_v48 = vsel %vm240_vm1, %v254_v43, %v253_v46 }
  0xb3   : > { %v257_v50 = vsel %vm244_vm2, %v256_v47, %v255_v48 }
  0xb4   : > { %v260_v51 = vsel %vm259_vm3, %v245_v49, %v257_v50 }
  0xb5   : > { %481 = vmatmul.msk.f32.vlgmr.msra.gmra.mxu0 %vm266_vm4, %v260_v51 }
 0x132   : > { %v287_v53 = vpop.f32.mrf.mxu0 }
 0x133   : > { %v290_v54 = vmax.f32 %v287_v53, 0.0 }
 0x135   : > { %483 = vmatmul.msk.f32.vlgmr.msra.gmra.mxu1 %vm291_vm6, %v290_v54 }
 0x1b2   : > { %v316_v58 = vpop.f32.mrf.mxu1 }
 0x1b3   : > { %v320_v59 = vrot.slane %v316_v58, 1 }
 0x1b5   : > { %v322_v60 = vadd.f32 %v320_v59, %v316_v58 }
 0x1b7   : > { %v484_v61 = vmul.f32 -1.442695, %v322_v60 }
 0x1b9   : > { %547 = vpow2.f32 %v484_v61 }
 0x1bf   : > { %v548_v62 = vpop.eup %547 }
 0x1c0   : > { %v326_v63 = vadd.f32 1.0, %v548_v62 }
 0x1c2   : > { %549 = vrcp.f32 %v326_v63  ;;  %v338_v11 = vand.u32 2147483648, %v326_v63  ;;  %v336_v13 = vand.u32 2147483647, %v326_v63  ;;  %vm332_vm8 = vweird.f32 %v326_v63 }
 0x1c4   : > { %v339_v15 = vor.u32 1.1754944e-38, %v338_v11  ;;  %vm337_vm10 = vcmp.eq.f32.partialorder %v336_v13, 8.507059e+37 }
 0x1c8   : > { %v550_v3 = vpop.eup %549 }
 0x1c9   : > { %v328_v4 = vmul.f32 %v550_v3, %v326_v63  ;;  %vm333_vm7 = vweird.f32 %v550_v3 }
 0x1ca   : > { %vm334_vm9 = vmor %vm332_vm8, %vm333_vm7 }
 0x1cb   : > { %v329_v6 = vsub.f32 1.0, %v328_v4 }
 0x1cd   : > { %v330_v12 = vmul.f32 %v550_v3, %v329_v6 }
 0x1cf   : > { %v331_v14 = vadd.f32 %v550_v3, %v330_v12 }
 0x1d1   : > { %v335_v16 = vsel %vm334_vm9, %v550_v3, %v331_v14 }
 0x1d2   : > { %v340_v17 = vsel %vm337_vm10, %v339_v15, %v335_v16 }
 0x1d3   : > { %v342_v18 = vperm.slane %v340_v17, 0 }
 0x1d5   : > { %359 = vperm.xlu1 %544, %v342_v18   ;;  %353 = vperm.xlu0 %543, %v342_v18  }
 0x1d6   : > { %347 = vperm.xlu2 %542, %v342_v18  }
 0x1dd   : > { %546 = vset.pattern.permute.xlu0 %v363_v19 }
 0x1de   : > { %545 = vset.pattern.permute.xlu2 %v363_v19 }
 0x1e6   : > { %365 = vperm.xlu2 %545, %v342_v18  }
 0x230   : > { %v348_v20 = vpop.permute.xlu2 %347 }
 0x231   : > { %v367_v21 = vmul.f32 %v348_v20, %v769_v0  ;;  %v368_v22 = vmul.f32 %v348_v20, %v771_v1 }
 0x233   : > { %375 = vst [vmem:[%s190_s22] sm:$0xff] %v367_v21 }
 0x234   : > { %376 = vst [vmem:[%s190_s22 + $0x8] sm:$0xff] %v368_v22 }
 0x240   : > { %v366_v23 = vpop.permute.xlu2 %365 }
 0x241   : > { %v373_v24 = vmul.f32 %v366_v23, %v787_v9  ;;  %v374_v25 = vmul.f32 %v366_v23, %v789_v10 }
 0x243   : > { %381 = vst [vmem:[%s190_s22 + $0x30] sm:$0xff] %v373_v24 }
 0x244   : > { %382 = vst [vmem:[%s190_s22 + $0x38] sm:$0xff] %v374_v25 }
 0x247   : > { %v360_v0 = vpop.permute.xlu1 %359  ;;  %v354_v1 = vpop.permute.xlu0 %353 }
 0x248   : > { %v371_v26 = vmul.f32 %v360_v0, %v773_v2  ;;  %v372_v27 = vmul.f32 %v360_v0, %v779_v5  ;;  %v369_v9 = vmul.f32 %v354_v1, %v783_v7  ;;  %v370_v10 = vmul.f32 %v354_v1, %v785_v8 }
 0x24a   : > { %379 = vst [vmem:[%s190_s22 + $0x20] sm:$0xff] %v371_v26 }
 0x24b   : > { %380 = vst [vmem:[%s190_s22 + $0x28] sm:$0xff] %v372_v27 }
 0x24c   : > { %377 = vst [vmem:[%s190_s22 + $0x10] sm:$0xff] %v369_v9 }
 0x24d   : > { %378 = vst [vmem:[%s190_s22 + $0x18] sm:$0xff] %v370_v10 }
 0x24e   : > { %608 = shalt.err (!%p605_p4)
}
 0x24f   : > { %s651_s29 = smov 256   ;;  %s652_s17 = smov 16  }
 0x250   : > { %494 = dma.vmem_to_hbm [thread:$0]  (%p723_p11), %s397_s6, 1024, %s399_s23, %s384_s16, %s651_s29, %s651_s29, %s652_s17  }
 0x251 PF: > { %s413_s19 = sand.u32 1, %s635_s12   ;;  %p868_p7 = scmp.ge.s32.totalorder %s647_s15, 2 }
 0x252   : > { %s414_s20 = scalar_lea.sflag [#allocation4], %s413_s19 }
 0x253   : > { %p501_p5 = pnand %p868_p7, %p727_p12 }
 0x255   : > { %p502_p8 = pneg %p501_p5 }
 0x257   : > { %630 = dma.done.wait (%p502_p8), %s414_s20, 1024  }
 0x258   : > { %632 = vsyncadd (%p502_p8), %s414_s20, 4294966272  ;;  %p16_p10 = scmp.ge.s32.totalorder %s698_s18, 4   ;;  %s869_s12 = smov %s639_s13 }
 0x259   : > { %s870_s13 = smov %s643_s14  ;;  %s871_s14 = smov %s710_s21 }
 0x25a   : > { %s872_s15 = smov %s698_s18  ;;  %18 = sbr.rel (!%p16_p10) target bundleno = 5 (0x5), region = 77 }
 0x25f   :  { %420 = vsyncpa [#allocation3], 1 }
 0x260   :  { %422 = vsyncpa [#allocation3 + $0x1], 1 }
 0x261   :  { %423 = vsyncpa [#allocation4], 1 }
 0x262   :  { %425 = vsyncpa [#allocation4 + $0x1], 1 }

</bundles_post_ra>
